<compile_context>
chip_gen: v5e
topology: v5e:2x2
jax: 0.10.0
libtpu: 0.0.40
codegen_flags: <defaults>
</compile_context>

<pallas_src>
import functools

import jax
import jax.numpy as jnp
from jax.experimental import pallas as pl
from jax.experimental.pallas import tpu as pltpu

_NEG = -1e30      # "minus infinity" used to mask invalid pooling positions
_LANE = 128


def _fused_conv_kernel(x_ref, w_ref, b_ref, mask_ref, o_ref, *, s_max):
    """All filter-size groups in one shot.

    x_ref:    (TB, S, D)        f32   activation tile (TB batch rows)
    w_ref:    (s_max*D, N_pad)  bf16  pre-transposed, zero-padded fused weights
    b_ref:    (1, N_pad)        f32   fused bias (zeros in padding columns)
    mask_ref: (S, N_pad)        f32   0 at valid conv positions, -1e30 otherwise
    o_ref:    (TB, N_pad)       f32   pooled features (lane-dense)
    """
    TB, S, D = x_ref.shape
    n_pad = o_ref.shape[-1]
    rows = TB * S

    # One reshape, hoisted out of the tap loop.
    x = x_ref[...].reshape(rows, D)                                   # f32

    # im2col via sublane rolls (XLU slot, otherwise idle): tap j holds x[t+j].
    # Wrap-around rows only ever land on positions masked out below.
    taps = [x]
    for j in range(1, s_max):
        taps.append(pltpu.roll(x, shift=rows - j, axis=0))
    xc = jnp.concatenate(taps, axis=1).astype(jnp.bfloat16)           # (rows, s_max*D)

    # Single bf16 MXU matmul with fused contraction K = s_max*D, f32 accumulate.
    y = jnp.dot(xc, w_ref[...], preferred_element_type=jnp.float32)   # (rows, n_pad)

    # Mask invalid window starts per filter group, then max-pool over positions.
    y = y.reshape(TB, S, n_pad) + mask_ref[...]
    pooled = jnp.max(y, axis=1)                                       # (TB, n_pad)

    # Bias + ReLU after the pool (max(ReLU(a_t+b)) == ReLU(max_t(a_t)+b)).
    # Epilogue kept in f32 (v5e has no bf16 VPU).
    o_ref[...] = jnp.maximum(pooled + b_ref[...], 0.0)


def _pick_batch_tile(B, S):
    """Batch tile: ~1k activation rows per tile; tiny vs. 64 MiB VMEM (v7x)."""
    tb = max(1, 1024 // max(1, S))
    if tb >= B:
        return B
    tb = max(8, (tb // 8) * 8)    # keep the (tb, N_pad) output block (8,128)-legal
    return min(tb, B)


def conv_features_forward(x_bsd, w_combined, b_combined, mask, s_max, tb):
    """x_bsd: (B, S, D) f32 -> (B, N_pad) f32 pooled conv features."""
    B, S, D = x_bsd.shape
    n_pad = w_combined.shape[1]

    b_pad = ((B + tb - 1) // tb) * tb
    if b_pad != B:
        x_bsd = jnp.pad(x_bsd, ((0, b_pad - B), (0, 0), (0, 0)))

    kernel = functools.partial(_fused_conv_kernel, s_max=s_max)
    out = pl.pallas_call(
        kernel,
        out_shape=jax.ShapeDtypeStruct((b_pad, n_pad), jnp.float32),
        grid=(b_pad // tb,),
        in_specs=[
            pl.BlockSpec((tb, S, D), lambda i: (i, 0, 0)),
            pl.BlockSpec((s_max * D, n_pad), lambda i: (0, 0)),
            pl.BlockSpec((1, n_pad), lambda i: (0, 0)),
            pl.BlockSpec((S, n_pad), lambda i: (0, 0)),
        ],
        out_specs=pl.BlockSpec((tb, n_pad), lambda i: (i, 0)),
        compiler_params=pltpu.CompilerParams(
            dimension_semantics=("parallel",)),
    )(x_bsd, w_combined, b_combined, mask)
    return out[:B]


class ConvFeatures:
    """JAX/Pallas port of the PyTorch ConvFeatures module (eval-mode forward)."""

    def __init__(self, word_dimension, filter_lengths, filter_counts,
                 dropout_rate, key):
        self.word_dimension = word_dimension
        self.filter_sizes = tuple(filter_lengths)
        self.filter_counts = tuple(filter_counts)
        self.dropout_rate = dropout_rate
        self.s_max = max(self.filter_sizes)
        self.n_total = sum(self.filter_counts)
        self.n_pad = ((self.n_total + _LANE - 1) // _LANE) * _LANE

        D = word_dimension
        w_full = jnp.zeros((self.s_max, D, self.n_pad), jnp.float32)
        self._ref_weights = []          # f32 per-group weights (for reference check)
        off = 0
        for size, num in zip(self.filter_sizes, self.filter_counts):
            key, wkey = jax.random.split(key)
            # kaiming_normal_, mode='fan_out', nonlinearity='relu':
            #   fan_out = out_channels * kh * kw ; std = sqrt(2 / fan_out)
            fan_out = num * size * D
            std = (2.0 / fan_out) ** 0.5
            w = std * jax.random.normal(wkey, (num, size, D), dtype=jnp.float32)
            self._ref_weights.append(w)
            # pre-transpose to (size, D, num); taps >= size stay zero.
            w_full = w_full.at[:size, :, off:off + num].set(
                jnp.transpose(w, (1, 2, 0)))
            off += num
        # Fused, pre-transposed, lane-dense-padded bf16 weight matrix.
        self.w_combined = w_full.reshape(
            self.s_max * D, self.n_pad).astype(jnp.bfloat16)
        # Conv2d biases are zero-initialized in the reference module.
        self.b_combined = jnp.zeros((1, self.n_pad), jnp.float32)

    def _position_mask(self, S):
        """(S, N_pad) mask: 0 where the conv window fits, -1e30 otherwise."""
        limits = []
        for size, num in zip(self.filter_sizes, self.filter_counts):
            limits += [S - size] * num
        limits += [S - 1] * (self.n_pad - self.n_total)
        limits = jnp.asarray(limits, jnp.int32)
        t_idx = jnp.arange(S, dtype=jnp.int32)[:, None]
        return jnp.where(t_idx <= limits[None, :], 0.0, _NEG).astype(jnp.float32)

    def __call__(self, embedded_words_nchw):
        # PyTorch input is NCHW (B, 1, S, D); squeeze the channel dim (glue).
        x_bsd = jnp.squeeze(embedded_words_nchw, axis=1).astype(jnp.float32)
        B, S, D = x_bsd.shape
        mask = self._position_mask(S)
        tb = _pick_batch_tile(B, S)
        out = conv_features_forward(
            x_bsd, self.w_combined, self.b_combined, mask, self.s_max, tb)
        # nn.Dropout in eval mode is the identity.
        # TODO(synk): training-mode dropout (scaled random mask) not implemented.
        return out[:, :self.n_total]


def _reference_forward(x_nchw, model):
    """Pure-JAX f32 reference matching the PyTorch forward."""
    x = jnp.squeeze(x_nchw, axis=1).astype(jnp.float32)
    B, S, D = x.shape
    feats = []
    for (size, num), w in zip(zip(model.filter_sizes, model.filter_counts),
                              model._ref_weights):
        s_out = S - size + 1
        conv = jnp.zeros((B, s_out, num), jnp.float32)
        for j in range(size):
            conv += jnp.einsum('bsd,fd->bsf', x[:, j:j + s_out, :], w[:, j, :])
        conv = jnp.maximum(conv, 0.0)          # bias is zero-initialized
        feats.append(jnp.max(conv, axis=1))
    return jnp.concatenate(feats, axis=1)


if __name__ == "__main__":
    key = jax.random.PRNGKey(0)
    B, S, D = 2, 16, 32
    filter_lengths = (3, 4, 5)
    filter_counts = (8, 8, 16)
    dropout_rate = 0.5

    key, xkey, pkey = jax.random.split(key, 3)
    # NCHW input, matching the PyTorch module's expected layout.
    x = jax.random.normal(xkey, (B, 1, S, D), dtype=jnp.float32)

    model = ConvFeatures(D, filter_lengths, filter_counts, dropout_rate, pkey)
    out = model(x)
    out = jax.block_until_ready(out)

    assert out.shape == (B, sum(filter_counts)), out.shape
    assert out.dtype == jnp.float32

    # Correctness vs. pure-JAX f32 reference (kernel uses bf16 MXU operands).
    ref = jax.block_until_ready(_reference_forward(x, model))
    max_err = float(jnp.max(jnp.abs(out - ref)))
    assert max_err < 6e-2, f"max abs error vs reference: {max_err}"

    print("KERNEL_OK")
</pallas_src>

<mosaic_0001>
module attributes {stable_mosaic.version = 11 : i64} {
  func.func @_fused_conv_kernel(%arg0: i32, %arg1: memref<2x16x32xf32, #tpu.memory_space<vmem>>, %arg2: memref<160x128xbf16, #tpu.memory_space<vmem>>, %arg3: memref<1x128xf32, #tpu.memory_space<vmem>>, %arg4: memref<16x128xf32, #tpu.memory_space<vmem>>, %arg5: memref<2x128xf32, #tpu.memory_space<vmem>>) attributes {dimension_semantics = [#tpu.dimension_semantics<parallel>], iteration_bounds = array<i64: 1>, scalar_prefetch = 0 : i64, scratch_operands = 0 : i64, tpu.core_type = #tpu.core_type<tc>, window_params = [{transform_indices = @transform_0, window_bounds = array<i64: 2, 16, 32>}, {pipeline_mode = #tpu.pipeline_mode<synchronous>, transform_indices = @transform_1, window_bounds = array<i64: 160, 128>}, {pipeline_mode = #tpu.pipeline_mode<synchronous>, transform_indices = @transform_2, window_bounds = array<i64: 1, 128>}, {pipeline_mode = #tpu.pipeline_mode<synchronous>, transform_indices = @transform_3, window_bounds = array<i64: 16, 128>}, {transform_indices = @transform_4, window_bounds = array<i64: 2, 128>}]} {
    %c0 = arith.constant 0 : index
    %c0_0 = arith.constant 0 : index
    %c0_1 = arith.constant 0 : index
    %0 = vector.load %arg1[%c0, %c0_0, %c0_1] : memref<2x16x32xf32, #tpu.memory_space<vmem>>, vector<2x16x32xf32>
    %1 = vector.shape_cast %0 : vector<2x16x32xf32> to vector<32x32xf32>
    %c31_i32 = arith.constant 31 : i32
    %2 = tpu.dynamic_rotate %1 by %c31_i32 dim 0 : vector<32x32xf32>, i32 -> vector<32x32xf32>
    %c30_i32 = arith.constant 30 : i32
    %3 = tpu.dynamic_rotate %1 by %c30_i32 dim 0 : vector<32x32xf32>, i32 -> vector<32x32xf32>
    %c29_i32 = arith.constant 29 : i32
    %4 = tpu.dynamic_rotate %1 by %c29_i32 dim 0 : vector<32x32xf32>, i32 -> vector<32x32xf32>
    %c28_i32 = arith.constant 28 : i32
    %5 = tpu.dynamic_rotate %1 by %c28_i32 dim 0 : vector<32x32xf32>, i32 -> vector<32x32xf32>
    %6 = tpu.concatenate %1, %2, %3, %4, %5 in 1 : vector<32x32xf32>, vector<32x32xf32>, vector<32x32xf32>, vector<32x32xf32>, vector<32x32xf32> -> vector<32x160xf32>
    %7 = arith.truncf %6 : vector<32x160xf32> to vector<32x160xbf16>
    %c0_2 = arith.constant 0 : index
    %c0_3 = arith.constant 0 : index
    %8 = vector.load %arg2[%c0_2, %c0_3] : memref<160x128xbf16, #tpu.memory_space<vmem>>, vector<160x128xbf16>
    %cst = arith.constant dense<0.000000e+00> : vector<32x128xf32>
    %9 = tpu.matmul %7, %8, %cst {dimension_numbers = #tpu.dot_dimension_numbers<[1], [0], [0], [1], [0, 0, 1, 1], [], []>} : vector<32x160xbf16>, vector<160x128xbf16>, vector<32x128xf32> -> vector<32x128xf32>
    %10 = vector.shape_cast %9 : vector<32x128xf32> to vector<2x16x128xf32>
    %c0_4 = arith.constant 0 : index
    %c0_5 = arith.constant 0 : index
    %11 = vector.load %arg4[%c0_4, %c0_5] : memref<16x128xf32, #tpu.memory_space<vmem>>, vector<16x128xf32>
    %12 = vector.shape_cast %11 : vector<16x128xf32> to vector<1x16x128xf32>
    %13 = vector.broadcast %12 : vector<1x16x128xf32> to vector<2x16x128xf32>
    %14 = arith.addf %10, %13 : vector<2x16x128xf32>
    %cst_6 = arith.constant dense<0xFF800000> : vector<2x128xf32>
    %15 = vector.multi_reduction <maximumf>, %14, %cst_6 [1] : vector<2x16x128xf32> to vector<2x128xf32>
    %c0_7 = arith.constant 0 : index
    %c0_8 = arith.constant 0 : index
    %16 = vector.load %arg3[%c0_7, %c0_8] : memref<1x128xf32, #tpu.memory_space<vmem>>, vector<1x128xf32>
    %17 = vector.broadcast %16 : vector<1x128xf32> to vector<2x128xf32>
    %18 = arith.addf %15, %17 : vector<2x128xf32>
    %cst_9 = arith.constant 0.000000e+00 : f32
    %19 = vector.broadcast %cst_9 : f32 to vector<2x128xf32>
    %20 = arith.maximumf %18, %19 : vector<2x128xf32>
    %c0_10 = arith.constant 0 : index
    %c0_11 = arith.constant 0 : index
    %21 = vector.load %arg5[%c0_10, %c0_11] : memref<2x128xf32, #tpu.memory_space<vmem>>, vector<2x128xf32>
    tpu.vector_store %arg5[%c0_10, %c0_11], %20 {strides = array<i32>} : memref<2x128xf32, #tpu.memory_space<vmem>>, vector<2x128xf32>,
    return
  }
  func.func @transform_0(%arg0: i32) -> (i32, i32, i32) {
    %c0_i32 = arith.constant 0 : i32
    %c0_i32_0 = arith.constant 0 : i32
    %c0_i32_1 = arith.constant 0 : i32
    return %arg0, %c0_i32, %c0_i32_0 : i32, i32, i32
  }
  func.func @transform_1(%arg0: i32) -> (i32, i32) {
    %c0_i32 = arith.constant 0 : i32
    %c0_i32_0 = arith.constant 0 : i32
    %c0_i32_1 = arith.constant 0 : i32
    return %c0_i32, %c0_i32_0 : i32, i32
  }
  func.func @transform_2(%arg0: i32) -> (i32, i32) {
    %c0_i32 = arith.constant 0 : i32
    %c0_i32_0 = arith.constant 0 : i32
    %c0_i32_1 = arith.constant 0 : i32
    return %c0_i32, %c0_i32_0 : i32, i32
  }
  func.func @transform_3(%arg0: i32) -> (i32, i32) {
    %c0_i32 = arith.constant 0 : i32
    %c0_i32_0 = arith.constant 0 : i32
    %c0_i32_1 = arith.constant 0 : i32
    return %c0_i32, %c0_i32_0 : i32, i32
  }
  func.func @transform_4(%arg0: i32) -> (i32, i32) {
    %c0_i32 = arith.constant 0 : i32
    %c0_i32_0 = arith.constant 0 : i32
    return %arg0, %c0_i32 : i32, i32
  }
}

</mosaic_0001>

<bundles_post_ra>
// kernel: tpu_custom_call.1
= control target key start
LH: loop header
LB: loop body
LE: loop exit
PB: predicated region body
PF: predicated region fallthrough
CT: control target
= control target key end

     0   :  { %9 = vsyncpa [#allocation3], 0  ;;  %s691_s0 = inlined_call_operand.hbm [shape: f32[2,16,32], index: 0, kind: input, shape index: {}]   ;;  %s692_s1 = inlined_call_operand.hbm [shape: bf16[160,128], index: 1, kind: input, shape index: {}]   ;;  %s693_s2 = inlined_call_operand.vmem [shape: f32[1,128], index: 2, kind: input, shape index: {}]   ;;  %s694_s3 = inlined_call_operand.hbm [shape: f32[16,128], index: 3, kind: input, shape index: {}]   ;;  %s695_s4 = inlined_call_operand.hbm [shape: f32[2,128], index: 4, kind: output, shape index: {}]  }
   0x1   :  { %10 = vsyncpa [#allocation6], 0  ;;  %s29_s17 = sshll.u32 %s692_s1, 4  ;;  %s30_s17 = int_to_ptr.hbm [resolvable:$true] %s29_s17 }
   0x2   :  { %11 = vsyncpa [#allocation4], 0  ;;  %s555_s18 = smov [#allocation5]   ;;  %s16_s22 = sshll.u32 %s691_s0, 4  ;;  %s17_s22 = int_to_ptr.hbm [resolvable:$true] %s16_s22 }
   0x3   :  { %s31_s19 = sshll.u32 %s555_s18, 4  ;;  %s556_s23 = smov 64   ;;  %s32_s19 = int_to_ptr.vmem [resolvable:$true] %s31_s19 }
   0x4   :  { %s557_s24 = smov 4   ;;  %s558_s25 = smov [#allocation2]  }
   0x5   :  { %37 = dma.hbm_to_vmem [thread:$0]  %s30_s17, 1280, %s32_s19, [#allocation6], %s556_s23, %s556_s23, %s557_s24  }
   0x6   :  { %s18_s26 = sshll.u32 %s558_s25, 4  ;;  %s559_s27 = smov 128   ;;  %s19_s26 = int_to_ptr.vmem [resolvable:$true] %s18_s26 }
   0x7   :  { %s560_s1 = smov 8   ;;  %s44_s30 = sshll.u32 %s694_s3, 4  ;;  %s45_s30 = int_to_ptr.hbm [resolvable:$true] %s44_s30 }
   0x8   :  { %24 = dma.hbm_to_vmem [thread:$0]  %s17_s22, 512, %s19_s26, [#allocation3], %s559_s27, %s559_s27, %s560_s1  }
   0x9   :  { %s561_s5 = smov [#allocation7]  }
   0xa   :  { %s46_s6 = sshll.u32 %s561_s5, 4  ;;  %s47_s6 = int_to_ptr.vmem [resolvable:$true] %s46_s6 }
   0xb   :  { %52 = dma.hbm_to_vmem [thread:$0]  %s45_s30, 256, %s47_s6, [#allocation6], %s559_s27, %s559_s27, %s560_s1  }
   0xc   :  { %549 = dma.done.wait [#allocation3], 512  }
   0xd   :  { %550 = vsyncadd [#allocation3], 4294966784 }
   0xe   :  { %551 = dma.done.wait [#allocation6], 1536  }
   0xf   :  { %552 = vsyncadd [#allocation6], 4294965760  ;;  %v74_v0 = vlaneseq  ;;  %v603_v2 = vld [vmem:[#allocation2] sm:$0xff]  ;;  %v605_v3 = vld [vmem:[#allocation2 + $0x10] sm:$0xff]  ;;  %s562_s0 = smov 96   ;;  %s563_s3 = smov 32  }
  0x10   :  { %v607_v4 = vld [vmem:[#allocation2 + $0x18] sm:$0xff]  ;;  %v90_v5 = vrot.slane %v603_v2, 3  ;;  %v92_v6 = vrot.slane %v605_v3, 3  ;;  %v70_v8 = vrot.slane %v603_v2, 1  ;;  %v615_v9 = vld [vmem:[#allocation2 + $0x8] sm:$0xff]  ;;  %v72_v11 = vrot.slane %v605_v3, 1 }
  0x11   :  { %v601_v1 = vshrl.u32 %v74_v0, 7  ;;  %v93_v7 = vrot.slane %v607_v4, 3  ;;  %v401_v10 = vld [vmem:[#allocation5 + $0x38] sm:$0xff]  ;;  %v73_v12 = vrot.slane %v607_v4, 1  ;;  %v81_v13 = vrot.slane %v603_v2, 2  ;;  %v403_v15 = vld [vmem:[#allocation5 + $0x48] sm:$0xff] }
  0x12   :  { %v83_v14 = vrot.slane %v605_v3, 2  ;;  %v84_v18 = vrot.slane %v607_v4, 2  ;;  %v71_v19 = vrot.slane %v615_v9, 1  ;;  %404 = vmatpush.bf16.msra.mxu2 %v401_v10  ;;  %261 = vmatpush.bf16.msra.mxu0 %v401_v10  ;;  %v400_v20 = vld [vmem:[#allocation5 + $0x30] sm:$0xff]  ;;  %v82_v24 = vrot.slane %v615_v9, 2  ;;  %v402_v25 = vld [vmem:[#allocation5 + $0x40] sm:$0xff] }
  0x13   :  { %vm94_vm0 = vcmp.lt.s32.totalorder %v601_v1, 5  ;;  %vm76_vm1 = vcmp.lt.s32.totalorder %v601_v1, 7  ;;  %286 = vmatpush.bf16.msra.mxu1 %v403_v15  ;;  %vm85_vm2 = vcmp.lt.s32.totalorder %v601_v1, 6  ;;  %v91_v32 = vrot.slane %v615_v9, 3  ;;  %v399_v33 = vld [vmem:[#allocation5 + $0x28] sm:$0xff]  ;;  %v398_v45 = vld [vmem:[#allocation5 + $0x20] sm:$0xff] }
  0x14   :  { %v95_v16 = vsel %vm94_vm0, %v92_v6, %v93_v7  ;;  %v98_v17 = vsel %vm94_vm0, %v93_v7, %v90_v5  ;;  %v77_v22 = vsel %vm76_vm1, %v72_v11, %v73_v12  ;;  %v80_v23 = vsel %vm76_vm1, %v73_v12, %v70_v8  ;;  %v397_v48 = vld [vmem:[#allocation5 + $0x18] sm:$0xff]  ;;  %v396_v49 = vld [vmem:[#allocation5 + $0x10] sm:$0xff]  ;;  %v395_v50 = vld [vmem:[#allocation5 + $0x8] sm:$0xff]  ;;  %s564_s9 = smov [#allocation8]   ;;  %s341_s13 = sshll.u32 %s695_s4, 4  ;;  %s342_s13 = int_to_ptr.hbm [resolvable:$true] %s341_s13 }
  0x15   :  { %v432_v21 = vpack.i.bf16 %v98_v17, %v95_v16  ;;  %v422_v26 = vpack.i.bf16 %v80_v23, %v77_v22  ;;  %v78_v27 = vsel %vm76_vm1, %v71_v19, %v72_v11  ;;  %v79_v28 = vsel %vm76_vm1, %v70_v8, %v71_v19  ;;  %v394_v52 = vld [vmem:[#allocation5] sm:$0xff]  ;;  %s339_s10 = sshll.u32 %s564_s9, 4  ;;  %s340_s10 = int_to_ptr.vmem [resolvable:$true] %s339_s10 }
  0x16   :  { %v87_v29 = vsel %vm85_vm2, %v82_v24, %v83_v14  ;;  %v88_v30 = vsel %vm85_vm2, %v81_v13, %v82_v24  ;;  %405 = vmatpush.bf16.msra.mxu2 %v400_v20  ;;  %v99_v34 = vrot.slane %v603_v2, 4  ;;  %vm103_vm3 = vcmp.lt.s32.totalorder %v601_v1, 4  ;;  %262 = vmatpush.bf16.msra.mxu0 %v400_v20 }
  0x17   :  { %433 = vrot.lane.b32.xlu1 %v432_v21, %s562_s0  ;;  %423 = vrot.lane.b32.xlu0 %v422_v26, %s563_s3  ;;  %v442_v31 = vpack.i.bf16 %v87_v29, %v88_v30  ;;  %v86_v35 = vsel %vm85_vm2, %v83_v14, %v84_v18  ;;  %v89_v36 = vsel %vm85_vm2, %v84_v18, %v81_v13  ;;  %v100_v37 = vrot.slane %v615_v9, 4  ;;  %v299_v30 = vld [vmem:[#allocation7] sm:$0xff] }
  0x18   :  { %287 = vmatpush.bf16.msra.mxu1 %v402_v25  ;;  %v101_v38 = vrot.slane %v605_v3, 4  ;;  %v437_v39 = vpack.i.bf16 %v78_v27, %v79_v28  ;;  %vm156_vm4 = vcmask 261120   ;;  %v96_v40 = vsel %vm94_vm0, %v91_v32, %v92_v6 }
  0x19   :  { %443 = vrot.lane.b32.xlu2 %v442_v31, %s556_s23  ;;  %v97_v41 = vsel %vm94_vm0, %v90_v5, %v91_v32  ;;  %v106_v43 = vsel %vm103_vm3, %v99_v34, %v100_v37  ;;  %v427_v44 = vpack.i.bf16 %v89_v36, %v86_v35  ;;  %v102_v51 = vrot.slane %v607_v4, 4  ;;  %v300_v32 = vld [vmem:[#allocation7 + $0x8] sm:$0xff] }
  0x1a   :  { %v105_v42 = vsel %vm103_vm3, %v100_v37, %v101_v38  ;;  %406 = vmatpush.bf16.msra.mxu2 %v399_v33  ;;  %263 = vmatpush.bf16.msra.mxu0 %v399_v33  ;;  %v447_v47 = vpack.i.bf16 %v96_v40, %v97_v41  ;;  %vm161_vm5 = vcmask 523264   ;;  %vm166_vm6 = vcmask 785408  }
  0x1b   :  { %v172_v46 = vpack.c.bf16 %v105_v42, %v106_v43  ;;  %v104_v53 = vsel %vm103_vm3, %v101_v38, %v102_v51  ;;  %v107_v54 = vsel %vm103_vm3, %v102_v51, %v99_v34  ;;  %vm330_vm7 = vcmask 1041409  }
  0x1c   :  { %v174_v55 = vpack.c.bf16 %v107_v54, %v104_v53 }
  0x1d   :  { %392 = vmatmul.msk.bf16.vlgmr.msra.gmra.mxu1 %vm156_vm4, %v172_v46 }
  0x1e   :  { %407 = vmatpush.bf16.msra.mxu2 %v398_v45  ;;  %264 = vmatpush.bf16.msra.mxu0 %v398_v45 }
  0x1f   :  { %438 = vrot.lane.b32.xlu1 %v437_v39, %s563_s3  ;;  %428 = vrot.lane.b32.xlu0 %v427_v44, %s556_s23 }
  0x21   :  { %448 = vrot.lane.b32.xlu2 %v447_v47, %s562_s0 }
  0x22   :  { %408 = vmatpush.bf16.msra.mxu2 %v397_v48  ;;  %265 = vmatpush.bf16.msra.mxu0 %v397_v48 }
  0x26   :  { %409 = vmatpush.bf16.msra.mxu2 %v396_v49  ;;  %266 = vmatpush.bf16.msra.mxu0 %v396_v49 }
  0x2a   :  { %410 = vmatpush.bf16.msra.mxu2 %v395_v50  ;;  %267 = vmatpush.bf16.msra.mxu0 %v395_v50 }
  0x2d   :  { %393 = vmatmul.msk.bf16.gmra.mxu1 %vm156_vm4, %v174_v55  ;;  %v452_v55 = vld [vmem:[%s693_s2] ss:$0 sm:$0xff] }
  0x2e   :  { %411 = vmatpush.bf16.msra.mxu2 %v394_v52  ;;  %268 = vmatpush.bf16.msra.mxu0 %v394_v52 }
  0x73   :  { %v444_v56 = vpop.permute.xlu2 %443 }
  0x74   :  { %v446_v62 = vunpack.i.h.bf16 %v444_v56  ;;  %v445_v63 = vunpack.i.l.bf16 %v444_v56 }
  0x7b   :  { %v449_v59 = vpop.permute.xlu2 %448 }
  0x7c   :  { %v451_v7 = vunpack.i.h.bf16 %v449_v59  ;;  %v450_v8 = vunpack.i.l.bf16 %v449_v59 }
  0x89   :  { %v434_v57 = vpop.permute.xlu1 %433  ;;  %v424_v58 = vpop.permute.xlu0 %423 }
  0x8a   :  { %v426_v60 = vunpack.i.h.bf16 %v424_v58  ;;  %v425_v61 = vunpack.i.l.bf16 %v424_v58  ;;  %v436_v10 = vunpack.i.h.bf16 %v434_v57  ;;  %v435_v11 = vunpack.i.l.bf16 %v434_v57 }
  0x8c   :  { %v160_v14 = vsel %vm156_vm4, %v607_v4, %v426_v60  ;;  %v159_v15 = vsel %vm156_vm4, %v605_v3, %v425_v61 }
  0x91   :  { %v439_v0 = vpop.permute.xlu1 %438  ;;  %v429_v5 = vpop.permute.xlu0 %428 }
  0x92   :  { %v441_v6 = vunpack.i.h.bf16 %v439_v0  ;;  %v440_v1 = vunpack.i.l.bf16 %v439_v0  ;;  %v431_v12 = vunpack.i.h.bf16 %v429_v5  ;;  %v430_v13 = vunpack.i.l.bf16 %v429_v5 }
  0x94   :  { %v158_v16 = vsel %vm156_vm4, %v615_v9, %v441_v6  ;;  %v157_v17 = vsel %vm156_vm4, %v603_v2, %v440_v1  ;;  %v164_v18 = vsel %vm161_vm5, %v159_v15, %v430_v13  ;;  %v165_v19 = vsel %vm161_vm5, %v160_v14, %v431_v12 }
  0x95   :  { %v162_v20 = vsel %vm161_vm5, %v157_v17, %v445_v63  ;;  %v163_v21 = vsel %vm161_vm5, %v158_v16, %v446_v62  ;;  %v169_v22 = vsel %vm166_vm6, %v164_v18, %v435_v11  ;;  %v170_v4 = vsel %vm166_vm6, %v165_v19, %v436_v10 }
  0x96   :  { %v167_v3 = vsel %vm166_vm6, %v162_v20, %v450_v8  ;;  %v168_v23 = vsel %vm166_vm6, %v163_v21, %v451_v7  ;;  %v173_v9 = vpack.c.bf16 %v170_v4, %v169_v22 }
  0x97   :  { %v171_v24 = vpack.c.bf16 %v168_v23, %v167_v3 }
  0x98   :  { %274 = vmatmul.bf16.vlgmr.msra.gmra.mxu2 %v173_v9 }
  0x99   :  { %269 = vmatmul.bf16.vlgmr.msra.gmra.mxu0 %v171_v24 }
  0x9a   :  { %v289_v2 = vpop.f32.mrf.mxu1 }
  0xa2   :  { %v291_v25 = vpop.f32.mrf.mxu1 }
  0xaa   :  { %v294_v27 = vpop.f32.mrf.mxu1 }
  0xb2   :  { %v296_v38 = vpop.f32.mrf.mxu1 }
 0x116   :  { %v270_v26 = vpop.f32.mrf.mxu0 }
 0x117   :  { %v290_v29 = vadd.f32 %v289_v2, %v270_v26 }
 0x119   :  { %v301_v34 = vadd.f32 %v299_v30, %v290_v29 }
 0x11b   :  { %v275_v28 = vpop.f32.mrf.mxu2 }
 0x11c   :  { %v295_v36 = vadd.f32 %v294_v27, %v275_v28 }
 0x11e   :  { %v272_v31 = vpop.f32.mrf.mxu0  ;;  %v303_v42 = vadd.f32 %v299_v30, %v295_v36 }
 0x11f   :  { %v292_v33 = vadd.f32 %v291_v25, %v272_v31 }
 0x121   :  { %v302_v35 = vadd.f32 %v300_v32, %v292_v33 }
 0x123   :  { %v305_v37 = vmax.f32 %v301_v34, %v302_v35  ;;  %v277_v39 = vpop.f32.mrf.mxu2 }
 0x124   :  { %v297_v41 = vadd.f32 %v296_v38, %v277_v39 }
 0x125   :  { %v306_v40 = vrot.slane %v305_v37, 4 }
 0x126   :  { %v304_v44 = vadd.f32 %v300_v32, %v297_v41 }
 0x127   :  { %v307_v43 = vmax.f32 %v305_v37, %v306_v40 }
 0x128   :  { %v312_v46 = vmax.f32 %v303_v42, %v304_v44 }
 0x129   :  { %v308_v45 = vrot.slane %v307_v43, 2 }
 0x12a   :  { %v313_v48 = vrot.slane %v312_v46, 4 }
 0x12b   :  { %v309_v47 = vmax.f32 %v307_v43, %v308_v45 }
 0x12c   :  { %v314_v49 = vmax.f32 %v312_v46, %v313_v48 }
 0x12d   :  { %v310_v50 = vrot.slane %v309_v47, 1 }
 0x12e   :  { %v315_v51 = vrot.slane %v314_v49, 2 }
 0x12f   :  { %v311_v53 = vmax.f32 %v309_v47, %v310_v50 }
 0x130   :  { %v316_v52 = vmax.f32 %v314_v49, %v315_v51 }
 0x131   :  { %v323_v57 = vadd.f32 %v452_v55, %v311_v53 }
 0x132   :  { %v317_v54 = vrot.slane %v316_v52, 1 }
 0x133   :  { %v325_v60 = vmax.f32 %v323_v57, 0.0 }
 0x134   :  { %v318_v56 = vmax.f32 %v316_v52, %v317_v54 }
 0x136   :  { %v324_v58 = vadd.f32 %v452_v55, %v318_v56 }
 0x138   :  { %v326_v59 = vmax.f32 %v324_v58, 0.0 }
 0x13a   :  { %v329_v61 = vrot.slane %v326_v59, 7 }
 0x13c   :  { %v331_v62 = vsel %vm330_vm7, %v329_v61, %v325_v60 }
 0x13d   :  { %333 = vst [vmem:[#allocation8] sm:$0x3] %v331_v62 }
 0x13e   :  { %344 = dma.vmem_to_hbm [thread:$0]  %s340_s10, 32, %s342_s13, [#allocation4]  }
 0x13f   :  { %553 = dma.done.wait [#allocation4], 32  }
 0x140   :  { %554 = vsyncadd [#allocation4], 4294967264 }
 0x141   :  { %349 = vsyncpa [#allocation3], 1 }
 0x142   :  { %350 = vsyncpa [#allocation6], 1 }
 0x143   :  { %351 = vsyncpa [#allocation4], 1 }

</bundles_post_ra>
